<compile_context>
chip_gen: v5e
topology: v5e:2x2
jax: 0.10.0
libtpu: 0.0.40
codegen_flags: <defaults>
</compile_context>

<pallas_src>
import jax
import jax.numpy as jnp
from jax.experimental import pallas as pl
from jax.experimental.pallas import tpu as pltpu


# --------------------------- batched matmul + bias ---------------------------
def matmul_bias_kernel(a_ref, w_ref, b_ref, o_ref):
    a = a_ref[...].astype(jnp.bfloat16)          # bf16 MXU operands
    o_ref[...] = (jnp.dot(a, w_ref[...], preferred_element_type=jnp.float32)
                  + b_ref[...])


def matmul_bias(a, w_bf16, b):
    """a:(M,K) f32, w:(K,N) bf16, b:(1,N) f32 -> (M,N) f32."""
    M, K = a.shape
    N = w_bf16.shape[-1]
    # TODO(synk): tile M and N (and set vmem_limit_bytes) for large T*B / vocab;
    # at these sizes a single full block is MXU-shaped and fits VMEM easily.
    tm = M
    return pl.pallas_call(
        matmul_bias_kernel,
        out_shape=jax.ShapeDtypeStruct((M, N), jnp.float32),
        grid_spec=pltpu.PrefetchScalarGridSpec(
            num_scalar_prefetch=0,
            grid=(M // tm,),
            in_specs=[
                pl.BlockSpec((tm, K), lambda i: (i, 0)),
                pl.BlockSpec((K, N), lambda i: (0, 0)),
                pl.BlockSpec((1, N), lambda i: (0, 0)),
            ],
            out_specs=pl.BlockSpec((tm, N), lambda i: (i, 0)),
        ),
        compiler_params=pltpu.CompilerParams(
            dimension_semantics=("parallel",)),
    )(a, w_bf16, b)


# ------------------------------ GRU recurrence -------------------------------
def gru_recurrence_kernel(xp_ref, wh_ref, h0_ref, y_ref, h_scr):
    """Whole-sequence GRU recurrence in one grid step.

    xp_ref: (T, B, 3H) f32  precomputed input-side pre-activations
                            (x·Wx + b [+ ctx·Wxc]) , gate order [z | r | n]
    wh_ref: (H, 3H)    bf16 fused recurrent weights
    h0_ref: (B, H)     f32  initial hidden state
    y_ref : (T, B, H)  f32  hidden state at every step
    h_scr : (B, H)     f32  carried hidden state (VMEM scratch)
    """
    T = xp_ref.shape[0]
    H = h0_ref.shape[-1]
    h_scr[...] = h0_ref[...]

    @pl.loop(0, T)
    def _(t):
        h = h_scr[...]                                        # (B, H)
        pre = xp_ref[t]                                       # (B, 3H)
        rec = jnp.dot(h.astype(jnp.bfloat16), wh_ref[...],
                      preferred_element_type=jnp.float32)     # (B, 3H), 1 MXU op
        z = jax.nn.sigmoid(pre[:, 0:H] + rec[:, 0:H])
        r = jax.nn.sigmoid(pre[:, H:2 * H] + rec[:, H:2 * H])
        n = jnp.tanh(pre[:, 2 * H:3 * H] + r * rec[:, 2 * H:3 * H])
        h_new = z * h + (1.0 - z) * n
        h_scr[...] = h_new
        y_ref[t] = h_new


def gru_recurrence(xp, wh_bf16, h0):
    """xp:(T,B,3H) f32, wh:(H,3H) bf16, h0:(B,H) f32 -> (T,B,H) f32."""
    T, B, G = xp.shape
    H = h0.shape[-1]
    # TODO(synk): chunk T over a grid axis (with the hidden state carried in the
    # scratch) when (T,B,3H)+(T,B,H) no longer fits VMEM; and shard B over the
    # two v7x TensorCores via a leading "parallel" grid axis for large batches.
    return pl.pallas_call(
        gru_recurrence_kernel,
        out_shape=jax.ShapeDtypeStruct((T, B, H), jnp.float32),
        grid_spec=pltpu.PrefetchScalarGridSpec(
            num_scalar_prefetch=0,
            grid=(1,),
            in_specs=[
                pl.BlockSpec((T, B, G), lambda i: (0, 0, 0)),
                pl.BlockSpec((H, G), lambda i: (0, 0)),
                pl.BlockSpec((B, H), lambda i: (0, 0)),
            ],
            out_specs=pl.BlockSpec((T, B, H), lambda i: (0, 0, 0)),
            scratch_shapes=[pltpu.VMEM((B, H), jnp.float32)],
        ),
        compiler_params=pltpu.CompilerParams(
            dimension_semantics=("arbitrary",)),
    )(xp, wh_bf16, h0)


# -------------------------- EncoderDecoder forward ---------------------------
def encoder_decoder_forward(params, enc_X, dec_X):
    """enc_X, dec_X: (B, T) int32 token ids.

    Returns (logits (B, T, V), state (1, B, H)) — same semantics as the
    PyTorch EncoderDecoder with a Seq2Seq GRU encoder/decoder.
    """
    B, Te = enc_X.shape
    _, Td = dec_X.shape
    H = params["enc_wh"].shape[0]
    V = params["dec_wo"].shape[1]
    E = params["enc_embedding"].shape[1]
    bf16 = jnp.bfloat16

    # one-time bf16 casts of matmul weights (halves weight DMA, feeds MXU bf16)
    enc_wx = params["enc_wx"].astype(bf16)
    enc_wh = params["enc_wh"].astype(bf16)
    dec_wxe = params["dec_wxe"].astype(bf16)
    dec_wxc = params["dec_wxc"].astype(bf16)
    dec_wh = params["dec_wh"].astype(bf16)
    dec_wo = params["dec_wo"].astype(bf16)

    # ---------------- encoder ----------------
    # TODO(synk): embedding gather stays as jnp.take glue (no clean BlockSpec form).
    enc_emb = jnp.take(params["enc_embedding"], enc_X, axis=0)      # (B, T, E)
    enc_emb = jnp.transpose(enc_emb, (1, 0, 2)).reshape(Te * B, E)  # (T*B, E)
    enc_pre = matmul_bias(enc_emb, enc_wx, params["enc_b"])         # (T*B, 3H)
    enc_pre = enc_pre.reshape(Te, B, 3 * H)
    h0 = jnp.zeros((B, H), jnp.float32)
    enc_H = gru_recurrence(enc_pre, enc_wh, h0)                     # (T, B, H)

    # decoder.init_state(enc_outputs): final encoder hidden state
    dec_state = enc_H[-1]                                           # (B, H)

    # ---------------- decoder ----------------
    dec_emb = jnp.take(params["dec_embedding"], dec_X, axis=0)      # (B, T, E)
    dec_emb = jnp.transpose(dec_emb, (1, 0, 2)).reshape(Td * B, E)  # (T*B, E)
    dec_pre = matmul_bias(dec_emb, dec_wxe, params["dec_b"])        # (T*B, 3H)
    # context projection is constant over time: compute once, broadcast-add
    ctx_pre = matmul_bias(dec_state, dec_wxc,
                          jnp.zeros((1, 3 * H), jnp.float32))       # (B, 3H)
    dec_pre = dec_pre.reshape(Td, B, 3 * H) + ctx_pre[None]
    dec_H = gru_recurrence(dec_pre, dec_wh, dec_state)              # (T, B, H)

    # deferred output projection: one lane-dense (T*B,H)x(H,V) matmul
    logits = matmul_bias(dec_H.reshape(Td * B, H), dec_wo,
                         params["dec_bo"])                          # (T*B, V)
    logits = logits.reshape(Td, B, V).transpose(1, 0, 2)            # (B, T, V)
    state = dec_H[-1][None]                                         # (1, B, H)
    return logits, state


def init_params(key, vocab_size, embed_size, hidden_size):
    ks = jax.random.split(key, 8)
    s = 0.1
    H3 = 3 * hidden_size
    return {
        "enc_embedding": s * jax.random.normal(ks[0], (vocab_size, embed_size), jnp.float32),
        "enc_wx": s * jax.random.normal(ks[1], (embed_size, H3), jnp.float32),
        "enc_wh": s * jax.random.normal(ks[2], (hidden_size, H3), jnp.float32),
        "enc_b": jnp.zeros((1, H3), jnp.float32),
        "dec_embedding": s * jax.random.normal(ks[3], (vocab_size, embed_size), jnp.float32),
        "dec_wxe": s * jax.random.normal(ks[4], (embed_size, H3), jnp.float32),
        "dec_wxc": s * jax.random.normal(ks[5], (hidden_size, H3), jnp.float32),
        "dec_wh": s * jax.random.normal(ks[6], (hidden_size, H3), jnp.float32),
        "dec_b": jnp.zeros((1, H3), jnp.float32),
        "dec_wo": s * jax.random.normal(ks[7], (hidden_size, vocab_size), jnp.float32),
        "dec_bo": jnp.zeros((1, vocab_size), jnp.float32),
    }


if __name__ == "__main__":
    # lane/sublane-aligned small shapes: B mult of 8, E/H/V mult of 128
    B, T, V, E, H = 8, 8, 128, 128, 128
    key = jax.random.PRNGKey(0)
    k_p, k_e, k_d = jax.random.split(key, 3)
    params = init_params(k_p, V, E, H)
    enc_X = jax.random.randint(k_e, (B, T), 0, V, dtype=jnp.int32)
    dec_X = jax.random.randint(k_d, (B, T), 0, V, dtype=jnp.int32)

    logits, state = jax.jit(encoder_decoder_forward)(params, enc_X, dec_X)
    jax.block_until_ready((logits, state))

    assert logits.shape == (B, T, V) and state.shape == (1, B, H)
    assert bool(jnp.all(jnp.isfinite(logits))) and bool(jnp.all(jnp.isfinite(state)))
    print("KERNEL_OK")
</pallas_src>

<mosaic_0001>
module attributes {stable_mosaic.version = 11 : i64} {
  func.func @matmul_bias_kernel(%arg0: i32, %arg1: memref<64x128xf32, #tpu.memory_space<vmem>>, %arg2: memref<128x384xbf16, #tpu.memory_space<vmem>>, %arg3: memref<1x384xf32, #tpu.memory_space<vmem>>, %arg4: memref<64x384xf32, #tpu.memory_space<vmem>>) attributes {dimension_semantics = [#tpu.dimension_semantics<parallel>], iteration_bounds = array<i64: 1>, scalar_prefetch = 0 : i64, scratch_operands = 0 : i64, tpu.core_type = #tpu.core_type<tc>, window_params = [{transform_indices = @transform_0, window_bounds = array<i64: 64, 128>}, {pipeline_mode = #tpu.pipeline_mode<synchronous>, transform_indices = @transform_1, window_bounds = array<i64: 128, 384>}, {pipeline_mode = #tpu.pipeline_mode<synchronous>, transform_indices = @transform_2, window_bounds = array<i64: 1, 384>}, {transform_indices = @transform_3, window_bounds = array<i64: 64, 384>}]} {
    %c0 = arith.constant 0 : index
    %c0_0 = arith.constant 0 : index
    %0 = vector.load %arg1[%c0, %c0_0] : memref<64x128xf32, #tpu.memory_space<vmem>>, vector<64x128xf32>
    %1 = arith.truncf %0 : vector<64x128xf32> to vector<64x128xbf16>
    %c0_1 = arith.constant 0 : index
    %c0_2 = arith.constant 0 : index
    %2 = vector.load %arg2[%c0_1, %c0_2] : memref<128x384xbf16, #tpu.memory_space<vmem>>, vector<128x384xbf16>
    %cst = arith.constant dense<0.000000e+00> : vector<64x384xf32>
    %3 = tpu.matmul %1, %2, %cst {dimension_numbers = #tpu.dot_dimension_numbers<[1], [0], [0], [1], [0, 0, 1, 1], [], []>} : vector<64x128xbf16>, vector<128x384xbf16>, vector<64x384xf32> -> vector<64x384xf32>
    %c0_3 = arith.constant 0 : index
    %c0_4 = arith.constant 0 : index
    %4 = vector.load %arg3[%c0_3, %c0_4] : memref<1x384xf32, #tpu.memory_space<vmem>>, vector<1x384xf32>
    %5 = vector.broadcast %4 : vector<1x384xf32> to vector<64x384xf32>
    %6 = arith.addf %3, %5 : vector<64x384xf32>
    %c0_5 = arith.constant 0 : index
    %c0_6 = arith.constant 0 : index
    %7 = vector.load %arg4[%c0_5, %c0_6] : memref<64x384xf32, #tpu.memory_space<vmem>>, vector<64x384xf32>
    tpu.vector_store %arg4[%c0_5, %c0_6], %6 {strides = array<i32>} : memref<64x384xf32, #tpu.memory_space<vmem>>, vector<64x384xf32>,
    return
  }
  func.func @transform_0(%arg0: i32) -> (i32, i32) {
    %c0_i32 = arith.constant 0 : i32
    %c0_i32_0 = arith.constant 0 : i32
    return %arg0, %c0_i32 : i32, i32
  }
  func.func @transform_1(%arg0: i32) -> (i32, i32) {
    %c0_i32 = arith.constant 0 : i32
    %c0_i32_0 = arith.constant 0 : i32
    %c0_i32_1 = arith.constant 0 : i32
    return %c0_i32, %c0_i32_0 : i32, i32
  }
  func.func @transform_2(%arg0: i32) -> (i32, i32) {
    %c0_i32 = arith.constant 0 : i32
    %c0_i32_0 = arith.constant 0 : i32
    %c0_i32_1 = arith.constant 0 : i32
    return %c0_i32, %c0_i32_0 : i32, i32
  }
  func.func @transform_3(%arg0: i32) -> (i32, i32) {
    %c0_i32 = arith.constant 0 : i32
    %c0_i32_0 = arith.constant 0 : i32
    return %arg0, %c0_i32 : i32, i32
  }
}

module attributes {stable_mosaic.version = 11 : i64} {
  func.func @matmul_bias_kernel(%arg0: i32, %arg1: memref<8x128xf32, #tpu.memory_space<vmem>>, %arg2: memref<128x384xbf16, #tpu.memory_space<vmem>>, %arg3: memref<1x384xf32, #tpu.memory_space<vmem>>, %arg4: memref<8x384xf32, #tpu.memory_space<vmem>>) attributes {dimension_semantics = [#tpu.dimension_semantics<parallel>], iteration_bounds = array<i64: 1>, scalar_prefetch = 0 : i64, scratch_operands = 0 : i64, tpu.core_type = #tpu.core_type<tc>, window_params = [{transform_indices = @transform_0, window_bounds = array<i64: 8, 128>}, {pipeline_mode = #tpu.pipeline_mode<synchronous>, transform_indices = @transform_1, window_bounds = array<i64: 128, 384>}, {pipeline_mode = #tpu.pipeline_mode<synchronous>, transform_indices = @transform_2, window_bounds = array<i64: 1, 384>}, {transform_indices = @transform_3, window_bounds = array<i64: 8, 384>}]} {
    %c0 = arith.constant 0 : index
    %c0_0 = arith.constant 0 : index
    %0 = vector.load %arg1[%c0, %c0_0] : memref<8x128xf32, #tpu.memory_space<vmem>>, vector<8x128xf32>
    %1 = arith.truncf %0 : vector<8x128xf32> to vector<8x128xbf16>
    %c0_1 = arith.constant 0 : index
    %c0_2 = arith.constant 0 : index
    %2 = vector.load %arg2[%c0_1, %c0_2] : memref<128x384xbf16, #tpu.memory_space<vmem>>, vector<128x384xbf16>
    %cst = arith.constant dense<0.000000e+00> : vector<8x384xf32>
    %3 = tpu.matmul %1, %2, %cst {dimension_numbers = #tpu.dot_dimension_numbers<[1], [0], [0], [1], [0, 0, 1, 1], [], []>} : vector<8x128xbf16>, vector<128x384xbf16>, vector<8x384xf32> -> vector<8x384xf32>
    %c0_3 = arith.constant 0 : index
    %c0_4 = arith.constant 0 : index
    %4 = vector.load %arg3[%c0_3, %c0_4] : memref<1x384xf32, #tpu.memory_space<vmem>>, vector<1x384xf32>
    %5 = vector.broadcast %4 : vector<1x384xf32> to vector<8x384xf32>
    %6 = arith.addf %3, %5 : vector<8x384xf32>
    %c0_5 = arith.constant 0 : index
    %c0_6 = arith.constant 0 : index
    %7 = vector.load %arg4[%c0_5, %c0_6] : memref<8x384xf32, #tpu.memory_space<vmem>>, vector<8x384xf32>
    tpu.vector_store %arg4[%c0_5, %c0_6], %6 {strides = array<i32>} : memref<8x384xf32, #tpu.memory_space<vmem>>, vector<8x384xf32>,
    return
  }
  func.func @transform_0(%arg0: i32) -> (i32, i32) {
    %c0_i32 = arith.constant 0 : i32
    %c0_i32_0 = arith.constant 0 : i32
    return %arg0, %c0_i32 : i32, i32
  }
  func.func @transform_1(%arg0: i32) -> (i32, i32) {
    %c0_i32 = arith.constant 0 : i32
    %c0_i32_0 = arith.constant 0 : i32
    %c0_i32_1 = arith.constant 0 : i32
    return %c0_i32, %c0_i32_0 : i32, i32
  }
  func.func @transform_2(%arg0: i32) -> (i32, i32) {
    %c0_i32 = arith.constant 0 : i32
    %c0_i32_0 = arith.constant 0 : i32
    %c0_i32_1 = arith.constant 0 : i32
    return %c0_i32, %c0_i32_0 : i32, i32
  }
  func.func @transform_3(%arg0: i32) -> (i32, i32) {
    %c0_i32 = arith.constant 0 : i32
    %c0_i32_0 = arith.constant 0 : i32
    return %arg0, %c0_i32 : i32, i32
  }
}

module attributes {stable_mosaic.version = 11 : i64} {
  func.func @gru_recurrence_kernel(%arg0: i32, %arg1: memref<8x8x384xf32, #tpu.memory_space<vmem>>, %arg2: memref<128x384xbf16, #tpu.memory_space<vmem>>, %arg3: memref<8x128xf32, #tpu.memory_space<vmem>>, %arg4: memref<8x8x128xf32, #tpu.memory_space<vmem>>, %arg5: memref<8x128xf32, #tpu.memory_space<vmem>>) attributes {dimension_semantics = [#tpu.dimension_semantics<arbitrary>], iteration_bounds = array<i64: 1>, scalar_prefetch = 0 : i64, scratch_operands = 1 : i64, tpu.core_type = #tpu.core_type<tc>, window_params = [{pipeline_mode = #tpu.pipeline_mode<synchronous>, transform_indices = @transform_0, window_bounds = array<i64: 8, 8, 384>}, {pipeline_mode = #tpu.pipeline_mode<synchronous>, transform_indices = @transform_1, window_bounds = array<i64: 128, 384>}, {pipeline_mode = #tpu.pipeline_mode<synchronous>, transform_indices = @transform_2, window_bounds = array<i64: 8, 128>}, {pipeline_mode = #tpu.pipeline_mode<synchronous>, transform_indices = @transform_3, window_bounds = array<i64: 8, 8, 128>}]} {
    %c0 = arith.constant 0 : index
    %c0_0 = arith.constant 0 : index
    %0 = vector.load %arg3[%c0, %c0_0] : memref<8x128xf32, #tpu.memory_space<vmem>>, vector<8x128xf32>
    %c0_1 = arith.constant 0 : index
    %c0_2 = arith.constant 0 : index
    %1 = vector.load %arg5[%c0_1, %c0_2] : memref<8x128xf32, #tpu.memory_space<vmem>>, vector<8x128xf32>
    tpu.vector_store %arg5[%c0_1, %c0_2], %0 {strides = array<i32>} : memref<8x128xf32, #tpu.memory_space<vmem>>, vector<8x128xf32>,
    %c0_i32 = arith.constant 0 : i32
    %c8_i32 = arith.constant 8 : i32
    %2 = arith.addi %c0_i32, %c8_i32 : i32
    %c1_i32 = arith.constant 1 : i32
    scf.for %arg6 = %c0_i32 to %2 step %c1_i32  : i32 {
      %c1_i32_4 = arith.constant 1 : i32
      %3 = arith.muli %arg6, %c1_i32_4 : i32
      %c0_i32_5 = arith.constant 0 : i32
      %4 = arith.addi %c0_i32_5, %3 : i32
      %c0_6 = arith.constant 0 : index
      %c0_7 = arith.constant 0 : index
      %5 = vector.load %arg5[%c0_6, %c0_7] : memref<8x128xf32, #tpu.memory_space<vmem>>, vector<8x128xf32>
      %6 = arith.index_cast %4 : i32 to index
      %c0_8 = arith.constant 0 : index
      %c0_9 = arith.constant 0 : index
      %7 = vector.load %arg1[%6, %c0_8, %c0_9] : memref<8x8x384xf32, #tpu.memory_space<vmem>>, vector<1x8x384xf32>
      %8 = vector.shape_cast %7 : vector<1x8x384xf32> to vector<8x384xf32>
      %9 = arith.truncf %5 : vector<8x128xf32> to vector<8x128xbf16>
      %c0_10 = arith.constant 0 : index
      %c0_11 = arith.constant 0 : index
      %10 = vector.load %arg2[%c0_10, %c0_11] : memref<128x384xbf16, #tpu.memory_space<vmem>>, vector<128x384xbf16>
      %cst = arith.constant dense<0.000000e+00> : vector<8x384xf32>
      %11 = tpu.matmul %9, %10, %cst {dimension_numbers = #tpu.dot_dimension_numbers<[1], [0], [0], [1], [0, 0, 1, 1], [], []>} : vector<8x128xbf16>, vector<128x384xbf16>, vector<8x384xf32> -> vector<8x384xf32>
      %12 = vector.extract_strided_slice %8 {offsets = [0, 0], sizes = [8, 128], strides = [1, 1]} : vector<8x384xf32> to vector<8x128xf32>
      %13 = vector.extract_strided_slice %11 {offsets = [0, 0], sizes = [8, 128], strides = [1, 1]} : vector<8x384xf32> to vector<8x128xf32>
      %14 = arith.addf %12, %13 : vector<8x128xf32>
      %15 = arith.negf %14 : vector<8x128xf32>
      %16 = math.exp %15 : vector<8x128xf32>
      %cst_12 = arith.constant 1.000000e+00 : f32
      %17 = vector.broadcast %cst_12 : f32 to vector<8x128xf32>
      %18 = arith.addf %17, %16 : vector<8x128xf32>
      %19 = arith.divf %17, %18 : vector<8x128xf32>
      %20 = vector.extract_strided_slice %8 {offsets = [0, 128], sizes = [8, 128], strides = [1, 1]} : vector<8x384xf32> to vector<8x128xf32>
      %21 = vector.extract_strided_slice %11 {offsets = [0, 128], sizes = [8, 128], strides = [1, 1]} : vector<8x384xf32> to vector<8x128xf32>
      %22 = arith.addf %20, %21 : vector<8x128xf32>
      %23 = arith.negf %22 : vector<8x128xf32>
      %24 = math.exp %23 : vector<8x128xf32>
      %cst_13 = arith.constant 1.000000e+00 : f32
      %25 = vector.broadcast %cst_13 : f32 to vector<8x128xf32>
      %26 = arith.addf %25, %24 : vector<8x128xf32>
      %27 = arith.divf %25, %26 : vector<8x128xf32>
      %28 = vector.extract_strided_slice %8 {offsets = [0, 256], sizes = [8, 128], strides = [1, 1]} : vector<8x384xf32> to vector<8x128xf32>
      %29 = vector.extract_strided_slice %11 {offsets = [0, 256], sizes = [8, 128], strides = [1, 1]} : vector<8x384xf32> to vector<8x128xf32>
      %30 = arith.mulf %27, %29 : vector<8x128xf32>
      %31 = arith.addf %28, %30 : vector<8x128xf32>
      %32 = math.tanh %31 : vector<8x128xf32>
      %33 = arith.mulf %19, %5 : vector<8x128xf32>
      %cst_14 = arith.constant 1.000000e+00 : f32
      %34 = vector.broadcast %cst_14 : f32 to vector<8x128xf32>
      %35 = arith.subf %34, %19 : vector<8x128xf32>
      %36 = arith.mulf %35, %32 : vector<8x128xf32>
      %37 = arith.addf %33, %36 : vector<8x128xf32>
      %c0_15 = arith.constant 0 : index
      %c0_16 = arith.constant 0 : index
      %38 = vector.load %arg5[%c0_15, %c0_16] : memref<8x128xf32, #tpu.memory_space<vmem>>, vector<8x128xf32>
      tpu.vector_store %arg5[%c0_15, %c0_16], %37 {strides = array<i32>} : memref<8x128xf32, #tpu.memory_space<vmem>>, vector<8x128xf32>,
      %39 = arith.index_cast %4 : i32 to index
      %c0_17 = arith.constant 0 : index
      %c0_18 = arith.constant 0 : index
      %40 = vector.load %arg4[%39, %c0_17, %c0_18] : memref<8x8x128xf32, #tpu.memory_space<vmem>>, vector<1x8x128xf32>
      %41 = vector.shape_cast %40 : vector<1x8x128xf32> to vector<8x128xf32>
      %42 = vector.shape_cast %37 : vector<8x128xf32> to vector<1x8x128xf32>
      tpu.vector_store %arg4[%39, %c0_17, %c0_18], %42 {strides = array<i32>} : memref<8x8x128xf32, #tpu.memory_space<vmem>>, vector<1x8x128xf32>,
    }
    %c8_i32_3 = arith.constant 8 : i32
    return
  }
  func.func @transform_0(%arg0: i32) -> (i32, i32, i32) {
    %c0_i32 = arith.constant 0 : i32
    %c0_i32_0 = arith.constant 0 : i32
    %c0_i32_1 = arith.constant 0 : i32
    %c0_i32_2 = arith.constant 0 : i32
    return %c0_i32, %c0_i32_0, %c0_i32_1 : i32, i32, i32
  }
  func.func @transform_1(%arg0: i32) -> (i32, i32) {
    %c0_i32 = arith.constant 0 : i32
    %c0_i32_0 = arith.constant 0 : i32
    %c0_i32_1 = arith.constant 0 : i32
    return %c0_i32, %c0_i32_0 : i32, i32
  }
  func.func @transform_2(%arg0: i32) -> (i32, i32) {
    %c0_i32 = arith.constant 0 : i32
    %c0_i32_0 = arith.constant 0 : i32
    %c0_i32_1 = arith.constant 0 : i32
    return %c0_i32, %c0_i32_0 : i32, i32
  }
  func.func @transform_3(%arg0: i32) -> (i32, i32, i32) {
    %c0_i32 = arith.constant 0 : i32
    %c0_i32_0 = arith.constant 0 : i32
    %c0_i32_1 = arith.constant 0 : i32
    %c0_i32_2 = arith.constant 0 : i32
    return %c0_i32, %c0_i32_0, %c0_i32_1 : i32, i32, i32
  }
}

module attributes {stable_mosaic.version = 11 : i64} {
  func.func @matmul_bias_kernel(%arg0: i32, %arg1: memref<64x128xf32, #tpu.memory_space<vmem>>, %arg2: memref<128x128xbf16, #tpu.memory_space<vmem>>, %arg3: memref<1x128xf32, #tpu.memory_space<vmem>>, %arg4: memref<64x128xf32, #tpu.memory_space<vmem>>) attributes {dimension_semantics = [#tpu.dimension_semantics<parallel>], iteration_bounds = array<i64: 1>, scalar_prefetch = 0 : i64, scratch_operands = 0 : i64, tpu.core_type = #tpu.core_type<tc>, window_params = [{transform_indices = @transform_0, window_bounds = array<i64: 64, 128>}, {pipeline_mode = #tpu.pipeline_mode<synchronous>, transform_indices = @transform_1, window_bounds = array<i64: 128, 128>}, {pipeline_mode = #tpu.pipeline_mode<synchronous>, transform_indices = @transform_2, window_bounds = array<i64: 1, 128>}, {transform_indices = @transform_3, window_bounds = array<i64: 64, 128>}]} {
    %c0 = arith.constant 0 : index
    %c0_0 = arith.constant 0 : index
    %0 = vector.load %arg1[%c0, %c0_0] : memref<64x128xf32, #tpu.memory_space<vmem>>, vector<64x128xf32>
    %1 = arith.truncf %0 : vector<64x128xf32> to vector<64x128xbf16>
    %c0_1 = arith.constant 0 : index
    %c0_2 = arith.constant 0 : index
    %2 = vector.load %arg2[%c0_1, %c0_2] : memref<128x128xbf16, #tpu.memory_space<vmem>>, vector<128x128xbf16>
    %cst = arith.constant dense<0.000000e+00> : vector<64x128xf32>
    %3 = tpu.matmul %1, %2, %cst {dimension_numbers = #tpu.dot_dimension_numbers<[1], [0], [0], [1], [0, 0, 1, 1], [], []>} : vector<64x128xbf16>, vector<128x128xbf16>, vector<64x128xf32> -> vector<64x128xf32>
    %c0_3 = arith.constant 0 : index
    %c0_4 = arith.constant 0 : index
    %4 = vector.load %arg3[%c0_3, %c0_4] : memref<1x128xf32, #tpu.memory_space<vmem>>, vector<1x128xf32>
    %5 = vector.broadcast %4 : vector<1x128xf32> to vector<64x128xf32>
    %6 = arith.addf %3, %5 : vector<64x128xf32>
    %c0_5 = arith.constant 0 : index
    %c0_6 = arith.constant 0 : index
    %7 = vector.load %arg4[%c0_5, %c0_6] : memref<64x128xf32, #tpu.memory_space<vmem>>, vector<64x128xf32>
    tpu.vector_store %arg4[%c0_5, %c0_6], %6 {strides = array<i32>} : memref<64x128xf32, #tpu.memory_space<vmem>>, vector<64x128xf32>,
    return
  }
  func.func @transform_0(%arg0: i32) -> (i32, i32) {
    %c0_i32 = arith.constant 0 : i32
    %c0_i32_0 = arith.constant 0 : i32
    return %arg0, %c0_i32 : i32, i32
  }
  func.func @transform_1(%arg0: i32) -> (i32, i32) {
    %c0_i32 = arith.constant 0 : i32
    %c0_i32_0 = arith.constant 0 : i32
    %c0_i32_1 = arith.constant 0 : i32
    return %c0_i32, %c0_i32_0 : i32, i32
  }
  func.func @transform_2(%arg0: i32) -> (i32, i32) {
    %c0_i32 = arith.constant 0 : i32
    %c0_i32_0 = arith.constant 0 : i32
    %c0_i32_1 = arith.constant 0 : i32
    return %c0_i32, %c0_i32_0 : i32, i32
  }
  func.func @transform_3(%arg0: i32) -> (i32, i32) {
    %c0_i32 = arith.constant 0 : i32
    %c0_i32_0 = arith.constant 0 : i32
    return %arg0, %c0_i32 : i32, i32
  }
}

</mosaic_0001>

<bundles_post_ra>
// kernel: encoder_decoder_forward.6
= control target key start
LH: loop header
LB: loop body
LE: loop exit
PB: predicated region body
PF: predicated region fallthrough
CT: control target
= control target key end

     0   :  { %s720_s1 = inlined_call_operand.vmem [shape: bf16[128,384], index: 1, kind: input, shape index: {}]   ;;  %s721_s0 = inlined_call_operand.vmem [shape: f32[64,128], index: 0, kind: input, shape index: {}]   ;;  %s722_s2 = inlined_call_operand.vmem [shape: f32[1,384], index: 2, kind: input, shape index: {}]   ;;  %s723_s3 = inlined_call_operand.vmem [shape: f32[64,384], index: 3, kind: output, shape index: {}]  }
   0x1   :  { %v426_v0 = vld [vmem:[%s720_s1 + $0xac] sm:$0xf]  ;;  %v397_v1 = vld [vmem:[%s720_s1 + $0xb4] sm:$0xf0]  ;;  %v403_v2 = vld [vmem:[%s720_s1 + $0xb0] sm:$0xf] }
   0x2   :  { %v400_v3 = vor.u32 %v426_v0, %v397_v1  ;;  %v428_v4 = vld [vmem:[%s720_s1 + $0xb8] sm:$0xf0]  ;;  %v423_v5 = vld [vmem:[%s720_s1 + $0x94] sm:$0xf]  ;;  %v385_v6 = vld [vmem:[%s720_s1 + $0x9c] sm:$0xf0] }
   0x3   :  { %v404_v7 = vor.u32 %v428_v4, %v403_v2  ;;  %v391_v8 = vld [vmem:[%s720_s1 + $0x98] sm:$0xf]  ;;  %v425_v9 = vld [vmem:[%s720_s1 + $0xa0] sm:$0xf0]  ;;  %v395_v10 = vld [vmem:[%s720_s1 + $0xa8] sm:$0xf]  ;;  %v388_v11 = vor.u32 %v423_v5, %v385_v6 }
   0x4   :  { %223 = vmatpush.bf16.msra.mxu1 %v400_v3  ;;  %v427_v12 = vld [vmem:[%s720_s1 + $0xb0] sm:$0xf0]  ;;  %v392_v13 = vor.u32 %v425_v9, %v391_v8  ;;  %v420_v15 = vld [vmem:[%s720_s1 + $0x7c] sm:$0xf]  ;;  %v373_v16 = vld [vmem:[%s720_s1 + $0x84] sm:$0xf0] }
   0x5   :  { %252 = vmatpush.bf16.msra.mxu2 %v404_v7  ;;  %v396_v14 = vor.u32 %v427_v12, %v395_v10  ;;  %v383_v17 = vld [vmem:[%s720_s1 + $0x90] sm:$0xf]  ;;  %v379_v18 = vld [vmem:[%s720_s1 + $0x80] sm:$0xf]  ;;  %v422_v19 = vld [vmem:[%s720_s1 + $0x88] sm:$0xf0]  ;;  %v376_v22 = vor.u32 %v420_v15, %v373_v16 }
   0x6   :  { %v424_v20 = vld [vmem:[%s720_s1 + $0x98] sm:$0xf0]  ;;  %v371_v23 = vld [vmem:[%s720_s1 + $0x78] sm:$0xf]  ;;  %v421_v24 = vld [vmem:[%s720_s1 + $0x80] sm:$0xf0]  ;;  %v380_v25 = vor.u32 %v422_v19, %v379_v18 }
   0x7   :  { %429 = vmatpush.bf16.msra.mxu3 %v396_v14  ;;  %v384_v21 = vor.u32 %v424_v20, %v383_v17  ;;  %194 = vmatpush.bf16.msra.mxu0 %v396_v14  ;;  %v417_v26 = vld [vmem:[%s720_s1 + $0x64] sm:$0xf]  ;;  %v361_v27 = vld [vmem:[%s720_s1 + $0x6c] sm:$0xf0]  ;;  %v367_v28 = vld [vmem:[%s720_s1 + $0x68] sm:$0xf]  ;;  %v372_v30 = vor.u32 %v421_v24, %v371_v23 }
   0x8   :  { %224 = vmatpush.bf16.msra.mxu1 %v388_v11  ;;  %v419_v29 = vld [vmem:[%s720_s1 + $0x70] sm:$0xf0]  ;;  %v364_v31 = vor.u32 %v417_v26, %v361_v27  ;;  %v359_v32 = vld [vmem:[%s720_s1 + $0x60] sm:$0xf]  ;;  %v418_v33 = vld [vmem:[%s720_s1 + $0x68] sm:$0xf0] }
   0x9   :  { %253 = vmatpush.bf16.msra.mxu2 %v392_v13  ;;  %v368_v34 = vor.u32 %v419_v29, %v367_v28  ;;  %v414_v35 = vld [vmem:[%s720_s1 + $0x4c] sm:$0xf]  ;;  %v349_v36 = vld [vmem:[%s720_s1 + $0x54] sm:$0xf0]  ;;  %v355_v37 = vld [vmem:[%s720_s1 + $0x50] sm:$0xf]  ;;  %v360_v39 = vor.u32 %v418_v33, %v359_v32 }
   0xa   :  { %v416_v38 = vld [vmem:[%s720_s1 + $0x58] sm:$0xf0]  ;;  %v352_v40 = vor.u32 %v414_v35, %v349_v36  ;;  %v347_v41 = vld [vmem:[%s720_s1 + $0x48] sm:$0xf]  ;;  %v415_v42 = vld [vmem:[%s720_s1 + $0x50] sm:$0xf0] }
   0xb   :  { %430 = vmatpush.bf16.msra.mxu3 %v384_v21  ;;  %195 = vmatpush.bf16.msra.mxu0 %v384_v21  ;;  %v356_v43 = vor.u32 %v416_v38, %v355_v37  ;;  %v411_v44 = vld [vmem:[%s720_s1 + $0x34] sm:$0xf]  ;;  %v337_v45 = vld [vmem:[%s720_s1 + $0x3c] sm:$0xf0]  ;;  %v343_v46 = vld [vmem:[%s720_s1 + $0x38] sm:$0xf]  ;;  %v348_v48 = vor.u32 %v415_v42, %v347_v41 }
   0xc   :  { %225 = vmatpush.bf16.msra.mxu1 %v376_v22  ;;  %v413_v47 = vld [vmem:[%s720_s1 + $0x40] sm:$0xf0]  ;;  %v340_v49 = vor.u32 %v411_v44, %v337_v45  ;;  %v335_v50 = vld [vmem:[%s720_s1 + $0x30] sm:$0xf]  ;;  %v412_v51 = vld [vmem:[%s720_s1 + $0x38] sm:$0xf0] }
   0xd   :  { %254 = vmatpush.bf16.msra.mxu2 %v380_v25  ;;  %v344_v52 = vor.u32 %v413_v47, %v343_v46  ;;  %v408_v53 = vld [vmem:[%s720_s1 + $0x1c] sm:$0xf]  ;;  %v325_v54 = vld [vmem:[%s720_s1 + $0x24] sm:$0xf0]  ;;  %v331_v55 = vld [vmem:[%s720_s1 + $0x20] sm:$0xf]  ;;  %v336_v57 = vor.u32 %v412_v51, %v335_v50 }
   0xe   :  { %v410_v56 = vld [vmem:[%s720_s1 + $0x28] sm:$0xf0]  ;;  %v328_v58 = vor.u32 %v408_v53, %v325_v54  ;;  %v323_v59 = vld [vmem:[%s720_s1 + $0x18] sm:$0xf]  ;;  %v409_v60 = vld [vmem:[%s720_s1 + $0x20] sm:$0xf0] }
   0xf   :  { %431 = vmatpush.bf16.msra.mxu3 %v372_v30  ;;  %196 = vmatpush.bf16.msra.mxu0 %v372_v30  ;;  %v332_v61 = vor.u32 %v410_v56, %v331_v55  ;;  %v405_v62 = vld [vmem:[%s720_s1 + $0x4] sm:$0xf]  ;;  %v313_v63 = vld [vmem:[%s720_s1 + $0xc] sm:$0xf0]  ;;  %v319_v0 = vld [vmem:[%s720_s1 + $0x8] sm:$0xf]  ;;  %v324_v3 = vor.u32 %v409_v60, %v323_v59 }
  0x10   :  { %226 = vmatpush.bf16.msra.mxu1 %v364_v31  ;;  %v407_v1 = vld [vmem:[%s720_s1 + $0x10] sm:$0xf0]  ;;  %v14_v2 = vld [vmem:[%s721_s0] sm:$0xff]  ;;  %v316_v4 = vor.u32 %v405_v62, %v313_v63  ;;  %v15_v5 = vld [vmem:[%s721_s0 + $0x8] sm:$0xff] }
  0x11   :  { %255 = vmatpush.bf16.msra.mxu2 %v368_v34  ;;  %v311_v6 = vld [vmem:[%s720_s1] sm:$0xf]  ;;  %v406_v7 = vld [vmem:[%s720_s1 + $0x8] sm:$0xf0]  ;;  %v320_v8 = vor.u32 %v407_v1, %v319_v0  ;;  %v22_v9 = vpack.c.bf16 %v15_v5, %v14_v2  ;;  %v16_v11 = vld [vmem:[%s721_s0 + $0x10] sm:$0xff] }
  0x12   :  { %v312_v10 = vor.u32 %v406_v7, %v311_v6  ;;  %v17_v12 = vld [vmem:[%s721_s0 + $0x18] sm:$0xff]  ;;  %v18_v14 = vld [vmem:[%s721_s0 + $0x20] sm:$0xff]  ;;  %v19_v15 = vld [vmem:[%s721_s0 + $0x28] sm:$0xff] }
  0x13   :  { %432 = vmatpush.bf16.msra.mxu3 %v360_v39  ;;  %197 = vmatpush.bf16.msra.mxu0 %v360_v39  ;;  %v23_v13 = vpack.c.bf16 %v17_v12, %v16_v11  ;;  %v24_v16 = vpack.c.bf16 %v19_v15, %v18_v14  ;;  %v20_v17 = vld [vmem:[%s721_s0 + $0x30] sm:$0xff]  ;;  %v21_v18 = vld [vmem:[%s721_s0 + $0x38] sm:$0xff]  ;;  %v58_v20 = vld [vmem:[%s722_s2] sm:$0x7] }
  0x14   :  { %227 = vmatpush.bf16.msra.mxu1 %v352_v40  ;;  %v25_v19 = vpack.c.bf16 %v21_v18, %v20_v17  ;;  %v628_v21 = vperm.slane %v58_v20, 1  ;;  %v634_v24 = vperm.slane %v58_v20, 2  ;;  %v60_v25 = vperm.slane %v58_v20, 0 }
  0x15   :  { %256 = vmatpush.bf16.msra.mxu2 %v356_v43 }
  0x17   :  { %433 = vmatpush.bf16.msra.mxu3 %v348_v48  ;;  %198 = vmatpush.bf16.msra.mxu0 %v348_v48 }
  0x18   :  { %228 = vmatpush.bf16.msra.mxu1 %v340_v49 }
  0x19   :  { %257 = vmatpush.bf16.msra.mxu2 %v344_v52 }
  0x1b   :  { %434 = vmatpush.bf16.msra.mxu3 %v336_v57  ;;  %199 = vmatpush.bf16.msra.mxu0 %v336_v57 }
  0x1c   :  { %229 = vmatpush.bf16.msra.mxu1 %v328_v58 }
  0x1d   :  { %258 = vmatpush.bf16.msra.mxu2 %v332_v61 }
  0x1f   :  { %435 = vmatpush.bf16.msra.mxu3 %v324_v3  ;;  %200 = vmatpush.bf16.msra.mxu0 %v324_v3 }
  0x20   :  { %230 = vmatpush.bf16.msra.mxu1 %v316_v4 }
  0x21   :  { %259 = vmatpush.bf16.msra.mxu2 %v320_v8 }
  0x23   :  { %231 = vmatmul.bf16.vlgmr.msra.gmra.mxu1 %v22_v9  ;;  %436 = vmatpush.bf16.msra.mxu3 %v312_v10 }
  0x24   :  { %260 = vmatmul.bf16.vlgmr.msra.gmra.mxu2 %v22_v9  ;;  %201 = vmatpush.bf16.msra.mxu0 %v312_v10 }
  0x26   :  { %207 = vmatmul.bf16.vlgmr.msra.gmra.mxu3 %v23_v13 }
  0x27   :  { %202 = vmatmul.bf16.vlgmr.msra.gmra.mxu0 %v22_v9 }
  0x33   :  { %236 = vmatmul.bf16.gmra.mxu1 %v23_v13 }
  0x34   :  { %265 = vmatmul.bf16.gmra.mxu2 %v23_v13 }
  0x36   :  { %212 = vmatmul.bf16.gmra.mxu3 %v24_v16 }
  0x43   :  { %241 = vmatmul.bf16.gmra.mxu1 %v24_v16 }
  0x44   :  { %270 = vmatmul.bf16.gmra.mxu2 %v24_v16 }
  0x46   :  { %217 = vmatmul.bf16.gmra.mxu3 %v25_v19 }
  0x53   :  { %246 = vmatmul.bf16.gmra.mxu1 %v25_v19 }
  0x54   :  { %275 = vmatmul.bf16.gmra.mxu2 %v25_v19 }
  0xa0   :  { %v232_v22 = vpop.f32.mrf.mxu1 }
  0xa1   :  { %v233_v23 = vadd.f32 %v232_v22, %v628_v21 }
  0xa3   :  { %282 = vst [vmem:[%s723_s3 + $0x8] sm:$0xff] %v233_v23 }
  0xa4   :  { %v203_v32 = vpop.f32.mrf.mxu0 }
  0xa5   :  { %v204_v33 = vadd.f32 %v203_v32, %v60_v25 }
  0xa7   :  { %v261_v26 = vpop.f32.mrf.mxu2  ;;  %281 = vst [vmem:[%s723_s3] sm:$0xff] %v204_v33 }
  0xa8   :  { %v262_v27 = vadd.f32 %v261_v26, %v634_v24  ;;  %v234_v28 = vpop.f32.mrf.mxu1 }
  0xa9   :  { %v235_v29 = vadd.f32 %v234_v28, %v628_v21  ;;  %v208_v30 = vpop.f32.mrf.mxu3 }
  0xaa   :  { %283 = vst [vmem:[%s723_s3 + $0x10] sm:$0xff] %v262_v27  ;;  %v209_v31 = vadd.f32 %v208_v30, %v60_v25 }
  0xab   :  { %285 = vst [vmem:[%s723_s3 + $0x20] sm:$0xff] %v235_v29 }
  0xac   :  { %287 = vst [vmem:[%s723_s3 + $0x30] sm:$0xff] %v209_v31  ;;  %v205_v40 = vpop.f32.mrf.mxu0 }
  0xad   :  { %v206_v41 = vadd.f32 %v205_v40, %v60_v25 }
  0xaf   :  { %v263_v34 = vpop.f32.mrf.mxu2  ;;  %284 = vst [vmem:[%s723_s3 + $0x18] sm:$0xff] %v206_v41 }
  0xb0   :  { %v264_v35 = vadd.f32 %v263_v34, %v634_v24  ;;  %v237_v36 = vpop.f32.mrf.mxu1 }
  0xb1   :  { %v238_v37 = vadd.f32 %v237_v36, %v628_v21  ;;  %v210_v38 = vpop.f32.mrf.mxu3 }
  0xb2   :  { %286 = vst [vmem:[%s723_s3 + $0x28] sm:$0xff] %v264_v35  ;;  %v211_v39 = vadd.f32 %v210_v38, %v60_v25 }
  0xb3   :  { %288 = vst [vmem:[%s723_s3 + $0x38] sm:$0xff] %v238_v37 }
  0xb4   :  { %290 = vst [vmem:[%s723_s3 + $0x48] sm:$0xff] %v211_v39 }
  0xb7   :  { %v266_v42 = vpop.f32.mrf.mxu2 }
  0xb8   :  { %v267_v43 = vadd.f32 %v266_v42, %v634_v24  ;;  %v239_v44 = vpop.f32.mrf.mxu1 }
  0xb9   :  { %v240_v45 = vadd.f32 %v239_v44, %v628_v21  ;;  %v213_v46 = vpop.f32.mrf.mxu3 }
  0xba   :  { %289 = vst [vmem:[%s723_s3 + $0x40] sm:$0xff] %v267_v43  ;;  %v214_v47 = vadd.f32 %v213_v46, %v60_v25 }
  0xbb   :  { %291 = vst [vmem:[%s723_s3 + $0x50] sm:$0xff] %v240_v45 }
  0xbc   :  { %293 = vst [vmem:[%s723_s3 + $0x60] sm:$0xff] %v214_v47 }
  0xbf   :  { %v268_v48 = vpop.f32.mrf.mxu2 }
  0xc0   :  { %v269_v49 = vadd.f32 %v268_v48, %v634_v24  ;;  %v242_v50 = vpop.f32.mrf.mxu1 }
  0xc1   :  { %v243_v51 = vadd.f32 %v242_v50, %v628_v21  ;;  %v215_v52 = vpop.f32.mrf.mxu3 }
  0xc2   :  { %292 = vst [vmem:[%s723_s3 + $0x58] sm:$0xff] %v269_v49  ;;  %v216_v53 = vadd.f32 %v215_v52, %v60_v25 }
  0xc3   :  { %294 = vst [vmem:[%s723_s3 + $0x68] sm:$0xff] %v243_v51 }
  0xc4   :  { %296 = vst [vmem:[%s723_s3 + $0x78] sm:$0xff] %v216_v53 }
  0xc7   :  { %v271_v54 = vpop.f32.mrf.mxu2 }
  0xc8   :  { %v272_v55 = vadd.f32 %v271_v54, %v634_v24  ;;  %v244_v56 = vpop.f32.mrf.mxu1 }
  0xc9   :  { %v245_v57 = vadd.f32 %v244_v56, %v628_v21  ;;  %v218_v58 = vpop.f32.mrf.mxu3 }
  0xca   :  { %295 = vst [vmem:[%s723_s3 + $0x70] sm:$0xff] %v272_v55  ;;  %v219_v59 = vadd.f32 %v218_v58, %v60_v25 }
  0xcb   :  { %297 = vst [vmem:[%s723_s3 + $0x80] sm:$0xff] %v245_v57 }
  0xcc   :  { %299 = vst [vmem:[%s723_s3 + $0x90] sm:$0xff] %v219_v59 }
  0xcf   :  { %v273_v60 = vpop.f32.mrf.mxu2 }
  0xd0   :  { %v274_v61 = vadd.f32 %v273_v60, %v634_v24  ;;  %v247_v62 = vpop.f32.mrf.mxu1 }
  0xd1   :  { %v248_v63 = vadd.f32 %v247_v62, %v628_v21  ;;  %v220_v0 = vpop.f32.mrf.mxu3 }
  0xd2   :  { %298 = vst [vmem:[%s723_s3 + $0x88] sm:$0xff] %v274_v61  ;;  %v221_v1 = vadd.f32 %v220_v0, %v60_v25 }
  0xd3   :  { %300 = vst [vmem:[%s723_s3 + $0x98] sm:$0xff] %v248_v63 }
  0xd4   :  { %302 = vst [vmem:[%s723_s3 + $0xa8] sm:$0xff] %v221_v1 }
  0xd7   :  { %v276_v2 = vpop.f32.mrf.mxu2 }
  0xd8   :  { %v277_v3 = vadd.f32 %v276_v2, %v634_v24  ;;  %v249_v4 = vpop.f32.mrf.mxu1 }
  0xd9   :  { %v250_v5 = vadd.f32 %v249_v4, %v628_v21 }
  0xda   :  { %301 = vst [vmem:[%s723_s3 + $0xa0] sm:$0xff] %v277_v3 }
  0xdb   :  { %303 = vst [vmem:[%s723_s3 + $0xb0] sm:$0xff] %v250_v5 }
  0xdf   :  { %v278_v6 = vpop.f32.mrf.mxu2 }
  0xe0   :  { %v279_v7 = vadd.f32 %v278_v6, %v634_v24 }
  0xe2   :  { %304 = vst [vmem:[%s723_s3 + $0xb8] sm:$0xff] %v279_v7 }

// kernel: encoder_decoder_forward.9
= control target key start
LH: loop header
LB: loop body
LE: loop exit
PB: predicated region body
PF: predicated region fallthrough
CT: control target
= control target key end

     0   :  { %s529_s1 = inlined_call_operand.vmem [shape: bf16[128,384], index: 1, kind: input, shape index: {}]   ;;  %s530_s0 = inlined_call_operand.vmem [shape: f32[8,128], index: 0, kind: input, shape index: {}]   ;;  %s531_s2 = inlined_call_operand.vmem [shape: f32[1,384], index: 2, kind: input, shape index: {}]   ;;  %s532_s3 = inlined_call_operand.vmem [shape: f32[8,384], index: 3, kind: output, shape index: {}]  }
   0x1   :  { %v316_v0 = vld [vmem:[%s529_s1 + $0xa8] sm:$0xf]  ;;  %v348_v1 = vld [vmem:[%s529_s1 + $0xb0] sm:$0xf0]  ;;  %v347_v2 = vld [vmem:[%s529_s1 + $0xac] sm:$0xf] }
   0x2   :  { %v317_v3 = vor.u32 %v348_v1, %v316_v0  ;;  %v318_v4 = vld [vmem:[%s529_s1 + $0xb4] sm:$0xf0]  ;;  %v324_v5 = vld [vmem:[%s529_s1 + $0xb0] sm:$0xf]  ;;  %v349_v6 = vld [vmem:[%s529_s1 + $0xb8] sm:$0xf0] }
   0x3   :  { %v321_v7 = vor.u32 %v347_v2, %v318_v4  ;;  %v325_v8 = vor.u32 %v349_v6, %v324_v5  ;;  %v304_v9 = vld [vmem:[%s529_s1 + $0x90] sm:$0xf]  ;;  %v345_v10 = vld [vmem:[%s529_s1 + $0x98] sm:$0xf0]  ;;  %v344_v11 = vld [vmem:[%s529_s1 + $0x94] sm:$0xf] }
   0x4   :  { %184 = vmatpush.bf16.msra.mxu0 %v317_v3  ;;  %v305_v12 = vor.u32 %v345_v10, %v304_v9  ;;  %v306_v13 = vld [vmem:[%s529_s1 + $0x9c] sm:$0xf0]  ;;  %v312_v14 = vld [vmem:[%s529_s1 + $0x98] sm:$0xf]  ;;  %v346_v15 = vld [vmem:[%s529_s1 + $0xa0] sm:$0xf0] }
   0x5   :  { %197 = vmatpush.bf16.msra.mxu1 %v321_v7  ;;  %210 = vmatpush.bf16.msra.mxu2 %v325_v8  ;;  %v309_v16 = vor.u32 %v344_v11, %v306_v13  ;;  %v313_v17 = vor.u32 %v346_v15, %v312_v14  ;;  %v292_v18 = vld [vmem:[%s529_s1 + $0x78] sm:$0xf]  ;;  %v342_v19 = vld [vmem:[%s529_s1 + $0x80] sm:$0xf0]  ;;  %v341_v20 = vld [vmem:[%s529_s1 + $0x7c] sm:$0xf] }
   0x6   :  { %v294_v21 = vld [vmem:[%s529_s1 + $0x84] sm:$0xf0]  ;;  %v300_v22 = vld [vmem:[%s529_s1 + $0x80] sm:$0xf]  ;;  %v343_v23 = vld [vmem:[%s529_s1 + $0x88] sm:$0xf0]  ;;  %v293_v24 = vor.u32 %v342_v19, %v292_v18 }
   0x7   :  { %v297_v25 = vor.u32 %v341_v20, %v294_v21  ;;  %v301_v26 = vor.u32 %v343_v23, %v300_v22  ;;  %v280_v27 = vld [vmem:[%s529_s1 + $0x60] sm:$0xf]  ;;  %v339_v28 = vld [vmem:[%s529_s1 + $0x68] sm:$0xf0]  ;;  %v338_v29 = vld [vmem:[%s529_s1 + $0x64] sm:$0xf] }
   0x8   :  { %185 = vmatpush.bf16.msra.mxu0 %v305_v12  ;;  %v282_v30 = vld [vmem:[%s529_s1 + $0x6c] sm:$0xf0]  ;;  %v288_v31 = vld [vmem:[%s529_s1 + $0x68] sm:$0xf]  ;;  %v340_v32 = vld [vmem:[%s529_s1 + $0x70] sm:$0xf0]  ;;  %v281_v33 = vor.u32 %v339_v28, %v280_v27 }
   0x9   :  { %198 = vmatpush.bf16.msra.mxu1 %v309_v16  ;;  %211 = vmatpush.bf16.msra.mxu2 %v313_v17  ;;  %v285_v34 = vor.u32 %v338_v29, %v282_v30  ;;  %v289_v35 = vor.u32 %v340_v32, %v288_v31  ;;  %v268_v36 = vld [vmem:[%s529_s1 + $0x48] sm:$0xf]  ;;  %v336_v37 = vld [vmem:[%s529_s1 + $0x50] sm:$0xf0]  ;;  %v335_v38 = vld [vmem:[%s529_s1 + $0x4c] sm:$0xf] }
   0xa   :  { %v270_v39 = vld [vmem:[%s529_s1 + $0x54] sm:$0xf0]  ;;  %v276_v40 = vld [vmem:[%s529_s1 + $0x50] sm:$0xf]  ;;  %v337_v41 = vld [vmem:[%s529_s1 + $0x58] sm:$0xf0]  ;;  %v269_v42 = vor.u32 %v336_v37, %v268_v36 }
   0xb   :  { %v273_v43 = vor.u32 %v335_v38, %v270_v39  ;;  %v277_v44 = vor.u32 %v337_v41, %v276_v40  ;;  %v256_v45 = vld [vmem:[%s529_s1 + $0x30] sm:$0xf]  ;;  %v333_v46 = vld [vmem:[%s529_s1 + $0x38] sm:$0xf0]  ;;  %v332_v47 = vld [vmem:[%s529_s1 + $0x34] sm:$0xf] }
   0xc   :  { %186 = vmatpush.bf16.msra.mxu0 %v293_v24  ;;  %v258_v48 = vld [vmem:[%s529_s1 + $0x3c] sm:$0xf0]  ;;  %v264_v49 = vld [vmem:[%s529_s1 + $0x38] sm:$0xf]  ;;  %v334_v50 = vld [vmem:[%s529_s1 + $0x40] sm:$0xf0]  ;;  %v257_v51 = vor.u32 %v333_v46, %v256_v45 }
   0xd   :  { %199 = vmatpush.bf16.msra.mxu1 %v297_v25  ;;  %212 = vmatpush.bf16.msra.mxu2 %v301_v26  ;;  %v261_v52 = vor.u32 %v332_v47, %v258_v48  ;;  %v265_v53 = vor.u32 %v334_v50, %v264_v49  ;;  %v244_v54 = vld [vmem:[%s529_s1 + $0x18] sm:$0xf]  ;;  %v330_v55 = vld [vmem:[%s529_s1 + $0x20] sm:$0xf0]  ;;  %v329_v56 = vld [vmem:[%s529_s1 + $0x1c] sm:$0xf] }
   0xe   :  { %v246_v57 = vld [vmem:[%s529_s1 + $0x24] sm:$0xf0]  ;;  %v252_v58 = vld [vmem:[%s529_s1 + $0x20] sm:$0xf]  ;;  %v331_v59 = vld [vmem:[%s529_s1 + $0x28] sm:$0xf0]  ;;  %v245_v60 = vor.u32 %v330_v55, %v244_v54 }
   0xf   :  { %v249_v61 = vor.u32 %v329_v56, %v246_v57  ;;  %v253_v62 = vor.u32 %v331_v59, %v252_v58  ;;  %v232_v63 = vld [vmem:[%s529_s1] sm:$0xf]  ;;  %v327_v0 = vld [vmem:[%s529_s1 + $0x8] sm:$0xf0]  ;;  %v326_v1 = vld [vmem:[%s529_s1 + $0x4] sm:$0xf] }
  0x10   :  { %187 = vmatpush.bf16.msra.mxu0 %v281_v33  ;;  %v234_v2 = vld [vmem:[%s529_s1 + $0xc] sm:$0xf0]  ;;  %v240_v3 = vld [vmem:[%s529_s1 + $0x8] sm:$0xf]  ;;  %v328_v4 = vld [vmem:[%s529_s1 + $0x10] sm:$0xf0]  ;;  %v233_v5 = vor.u32 %v327_v0, %v232_v63 }
  0x11   :  { %200 = vmatpush.bf16.msra.mxu1 %v285_v34  ;;  %213 = vmatpush.bf16.msra.mxu2 %v289_v35  ;;  %v14_v6 = vld [vmem:[%s530_s0] sm:$0xff]  ;;  %v237_v7 = vor.u32 %v326_v1, %v234_v2  ;;  %v241_v8 = vor.u32 %v328_v4, %v240_v3 }
  0x12   :  { %v15_v9 = vpack.c.bf16 %v14_v6, %v14_v6  ;;  %v48_v10 = vld [vmem:[%s531_s2] sm:$0x7] }
  0x13   :  { %v50_v11 = vperm.slane %v48_v10, 0  ;;  %v51_v12 = vperm.slane %v48_v10, 1  ;;  %v52_v17 = vperm.slane %v48_v10, 2 }
  0x14   :  { %188 = vmatpush.bf16.msra.mxu0 %v269_v42 }
  0x15   :  { %201 = vmatpush.bf16.msra.mxu1 %v273_v43  ;;  %214 = vmatpush.bf16.msra.mxu2 %v277_v44 }
  0x18   :  { %189 = vmatpush.bf16.msra.mxu0 %v257_v51 }
  0x19   :  { %202 = vmatpush.bf16.msra.mxu1 %v261_v52  ;;  %215 = vmatpush.bf16.msra.mxu2 %v265_v53 }
  0x1c   :  { %190 = vmatpush.bf16.msra.mxu0 %v245_v60 }
  0x1d   :  { %203 = vmatpush.bf16.msra.mxu1 %v249_v61  ;;  %216 = vmatpush.bf16.msra.mxu2 %v253_v62 }
  0x20   :  { %191 = vmatpush.bf16.msra.mxu0 %v233_v5 }
  0x21   :  { %204 = vmatpush.bf16.msra.mxu1 %v237_v7  ;;  %217 = vmatpush.bf16.msra.mxu2 %v241_v8 }
  0x23   :  { %192 = vmatmul.bf16.vlgmr.msra.gmra.mxu0 %v15_v9 }
  0x24   :  { %205 = vmatmul.bf16.vlgmr.msra.gmra.mxu1 %v15_v9  ;;  %218 = vmatmul.bf16.vlgmr.msra.gmra.mxu2 %v15_v9 }
  0xa0   :  { %v193_v13 = vpop.f32.mrf.mxu0 }
  0xa1   :  { %v194_v14 = vadd.f32 %v193_v13, %v50_v11  ;;  %v206_v15 = vpop.f32.mrf.mxu1 }
  0xa2   :  { %v207_v16 = vadd.f32 %v206_v15, %v51_v12 }
  0xa3   :  { %223 = vst [vmem:[%s532_s3] sm:$0xff] %v194_v14 }
  0xa4   :  { %224 = vst [vmem:[%s532_s3 + $0x8] sm:$0xff] %v207_v16 }
  0xa7   :  { %v219_v18 = vpop.f32.mrf.mxu2 }
  0xa8   :  { %v220_v19 = vadd.f32 %v219_v18, %v52_v17  ;;  %v195_v20 = vpop.f32.mrf.mxu0 }
  0xa9   :  { %v208_v21 = vpop.f32.mrf.mxu1 }
  0xaa   :  { %225 = vst [vmem:[%s532_s3 + $0x10] sm:$0xff] %v220_v19 }
  0xaf   :  { %v221_v22 = vpop.f32.mrf.mxu2 }

// kernel: encoder_decoder_forward.7
= control target key start
LH: loop header
LB: loop body
LE: loop exit
PB: predicated region body
PF: predicated region fallthrough
CT: control target
= control target key end

     0   :  { %s467_s14 = smov 0   ;;  %s637_s0 = inlined_call_operand.vmem [shape: f32[8,8,384], index: 0, kind: input, shape index: {}]   ;;  %s638_s1 = inlined_call_operand.vmem [shape: bf16[128,384], index: 1, kind: input, shape index: {}]   ;;  %s639_s2 = inlined_call_operand.vmem [shape: f32[8,128], index: 2, kind: input, shape index: {}]   ;;  %s640_s3 = inlined_call_operand.vmem [shape: f32[8,8,128], index: 3, kind: output, shape index: {}]  }
   0x1   :  { %v14_v0 = vld [vmem:[%s639_s2] sm:$0xff] }
   0x2   :  { %15 = vst [vmem:[#allocation2] sm:$0xff] %v14_v0 }
   0x3 LB: > { %v380_v1 = vld [vmem:[%s638_s1 + $0xa8] sm:$0xf]  ;;  %v416_v2 = vld [vmem:[%s638_s1 + $0xb0] sm:$0xf0]  ;;  %v415_v3 = vld [vmem:[%s638_s1 + $0xac] sm:$0xf]  ;;  %s442_s14 = sphi %s467_s14, %s21_s14  }
   0x4   : > { %v381_v4 = vor.u32 %v416_v2, %v380_v1  ;;  %v382_v5 = vld [vmem:[%s638_s1 + $0xb4] sm:$0xf0]  ;;  %v368_v6 = vld [vmem:[%s638_s1 + $0x90] sm:$0xf]  ;;  %v413_v7 = vld [vmem:[%s638_s1 + $0x98] sm:$0xf0] }
   0x5   : > { %v385_v8 = vor.u32 %v415_v3, %v382_v5  ;;  %v412_v9 = vld [vmem:[%s638_s1 + $0x94] sm:$0xf]  ;;  %v370_v10 = vld [vmem:[%s638_s1 + $0x9c] sm:$0xf0]  ;;  %v369_v11 = vor.u32 %v413_v7, %v368_v6  ;;  %v356_v13 = vld [vmem:[%s638_s1 + $0x78] sm:$0xf] }
   0x6   : > { %190 = vmatpush.bf16.msra.mxu0 %v381_v4  ;;  %v373_v12 = vor.u32 %v412_v9, %v370_v10  ;;  %v410_v14 = vld [vmem:[%s638_s1 + $0x80] sm:$0xf0]  ;;  %v409_v15 = vld [vmem:[%s638_s1 + $0x7c] sm:$0xf]  ;;  %v358_v16 = vld [vmem:[%s638_s1 + $0x84] sm:$0xf0] }
   0x7   : > { %203 = vmatpush.bf16.msra.mxu1 %v385_v8  ;;  %v388_v17 = vld [vmem:[%s638_s1 + $0xb0] sm:$0xf]  ;;  %v357_v18 = vor.u32 %v410_v14, %v356_v13  ;;  %v417_v19 = vld [vmem:[%s638_s1 + $0xb8] sm:$0xf0]  ;;  %v361_v20 = vor.u32 %v409_v15, %v358_v16  ;;  %v344_v21 = vld [vmem:[%s638_s1 + $0x60] sm:$0xf] }
   0x8   : > { %v407_v22 = vld [vmem:[%s638_s1 + $0x68] sm:$0xf0]  ;;  %v389_v23 = vor.u32 %v417_v19, %v388_v17  ;;  %v376_v24 = vld [vmem:[%s638_s1 + $0x98] sm:$0xf]  ;;  %v406_v25 = vld [vmem:[%s638_s1 + $0x64] sm:$0xf] }
   0x9   : > { %v346_v26 = vld [vmem:[%s638_s1 + $0x6c] sm:$0xf0]  ;;  %v414_v27 = vld [vmem:[%s638_s1 + $0xa0] sm:$0xf0]  ;;  %v345_v29 = vor.u32 %v407_v22, %v344_v21  ;;  %v364_v30 = vld [vmem:[%s638_s1 + $0x80] sm:$0xf] }
   0xa   : > { %191 = vmatpush.bf16.msra.mxu0 %v369_v11  ;;  %216 = vmatpush.bf16.msra.mxu2 %v389_v23  ;;  %v377_v28 = vor.u32 %v414_v27, %v376_v24  ;;  %v411_v31 = vld [vmem:[%s638_s1 + $0x88] sm:$0xf0]  ;;  %v349_v32 = vor.u32 %v406_v25, %v346_v26  ;;  %v332_v33 = vld [vmem:[%s638_s1 + $0x48] sm:$0xf]  ;;  %v404_v34 = vld [vmem:[%s638_s1 + $0x50] sm:$0xf0] }
   0xb   : > { %204 = vmatpush.bf16.msra.mxu1 %v373_v12  ;;  %v403_v35 = vld [vmem:[%s638_s1 + $0x4c] sm:$0xf]  ;;  %v334_v36 = vld [vmem:[%s638_s1 + $0x54] sm:$0xf0]  ;;  %v365_v37 = vor.u32 %v411_v31, %v364_v30  ;;  %v333_v38 = vor.u32 %v404_v34, %v332_v33  ;;  %v352_v39 = vld [vmem:[%s638_s1 + $0x68] sm:$0xf] }
   0xc   : > { %v408_v40 = vld [vmem:[%s638_s1 + $0x70] sm:$0xf0]  ;;  %v337_v41 = vor.u32 %v403_v35, %v334_v36  ;;  %v320_v42 = vld [vmem:[%s638_s1 + $0x30] sm:$0xf]  ;;  %v401_v43 = vld [vmem:[%s638_s1 + $0x38] sm:$0xf0] }
   0xd   : > { %v400_v44 = vld [vmem:[%s638_s1 + $0x34] sm:$0xf]  ;;  %v322_v45 = vld [vmem:[%s638_s1 + $0x3c] sm:$0xf0]  ;;  %v353_v46 = vor.u32 %v408_v40, %v352_v39  ;;  %v321_v47 = vor.u32 %v401_v43, %v320_v42  ;;  %v340_v48 = vld [vmem:[%s638_s1 + $0x50] sm:$0xf] }
   0xe   : > { %192 = vmatpush.bf16.msra.mxu0 %v357_v18  ;;  %217 = vmatpush.bf16.msra.mxu2 %v377_v28  ;;  %v405_v49 = vld [vmem:[%s638_s1 + $0x58] sm:$0xf0]  ;;  %v325_v50 = vor.u32 %v400_v44, %v322_v45  ;;  %v308_v51 = vld [vmem:[%s638_s1 + $0x18] sm:$0xf]  ;;  %v398_v52 = vld [vmem:[%s638_s1 + $0x20] sm:$0xf0] }
   0xf   : > { %205 = vmatpush.bf16.msra.mxu1 %v361_v20  ;;  %v397_v53 = vld [vmem:[%s638_s1 + $0x1c] sm:$0xf]  ;;  %v310_v54 = vld [vmem:[%s638_s1 + $0x24] sm:$0xf0]  ;;  %v341_v55 = vor.u32 %v405_v49, %v340_v48  ;;  %v309_v56 = vor.u32 %v398_v52, %v308_v51  ;;  %v328_v57 = vld [vmem:[%s638_s1 + $0x38] sm:$0xf] }
  0x10   : > { %v402_v58 = vld [vmem:[%s638_s1 + $0x40] sm:$0xf0]  ;;  %v313_v59 = vor.u32 %v397_v53, %v310_v54  ;;  %v296_v60 = vld [vmem:[%s638_s1] sm:$0xf]  ;;  %v395_v61 = vld [vmem:[%s638_s1 + $0x8] sm:$0xf0] }
  0x11   : > { %v394_v62 = vld [vmem:[%s638_s1 + $0x4] sm:$0xf]  ;;  %v298_v63 = vld [vmem:[%s638_s1 + $0xc] sm:$0xf0]  ;;  %v329_v0 = vor.u32 %v402_v58, %v328_v57  ;;  %v297_v1 = vor.u32 %v395_v61, %v296_v60  ;;  %v316_v3 = vld [vmem:[%s638_s1 + $0x20] sm:$0xf] }
  0x12   : > { %193 = vmatpush.bf16.msra.mxu0 %v345_v29  ;;  %218 = vmatpush.bf16.msra.mxu2 %v365_v37  ;;  %v604_v2 = vld [vmem:[#allocation2] sm:$0xff]  ;;  %v399_v4 = vld [vmem:[%s638_s1 + $0x28] sm:$0xf0]  ;;  %v301_v5 = vor.u32 %v394_v62, %v298_v63  ;;  %v304_v8 = vld [vmem:[%s638_s1 + $0x8] sm:$0xf]  ;;  %s393_s29 = smul.u32 24, %s442_s14 }
  0x13   : > { %206 = vmatpush.bf16.msra.mxu1 %v349_v32  ;;  %v29_v6 = vpack.c.bf16 %v604_v2, %v604_v2  ;;  %v317_v7 = vor.u32 %v399_v4, %v316_v3  ;;  %v396_v9 = vld [vmem:[%s638_s1 + $0x10] sm:$0xf0]  ;;  %s392_s6 = sshll.u32 %s442_s14, 3  ;;  %s21_s14 = sadd.s32 1, %s442_s14  }
  0x14   : > { %v305_v10 = vor.u32 %v396_v9, %v304_v8  ;;  %s624_s5 = scalar_lea.vmem %s637_s0, %s393_s29  ;;  %s278_s9 = scalar_lea.vmem %s640_s3, %s392_s6 }
  0x15   : > { %v26_v11 = vld [vmem:[%s624_s5] sm:$0xff]  ;;  %v27_v12 = vld [vmem:[%s624_s5 + $0x8] sm:$0xff]  ;;  %v28_v40 = vld [vmem:[%s624_s5 + $0x10] sm:$0xff]  ;;  %p18_p0 = scmp.ge.s32.totalorder %s21_s14, 8  }
  0x16   : > { %194 = vmatpush.bf16.msra.mxu0 %v333_v38  ;;  %219 = vmatpush.bf16.msra.mxu2 %v353_v46 }
  0x17   : > { %207 = vmatpush.bf16.msra.mxu1 %v337_v41 }
  0x1a   : > { %195 = vmatpush.bf16.msra.mxu0 %v321_v47  ;;  %220 = vmatpush.bf16.msra.mxu2 %v341_v55 }
  0x1b   : > { %208 = vmatpush.bf16.msra.mxu1 %v325_v50 }
  0x1e   : > { %196 = vmatpush.bf16.msra.mxu0 %v309_v56  ;;  %221 = vmatpush.bf16.msra.mxu2 %v329_v0 }
  0x1f   : > { %209 = vmatpush.bf16.msra.mxu1 %v313_v59 }
  0x22   : > { %197 = vmatpush.bf16.msra.mxu0 %v297_v1  ;;  %222 = vmatpush.bf16.msra.mxu2 %v317_v7 }
  0x23   : > { %210 = vmatpush.bf16.msra.mxu1 %v301_v5 }
  0x25   : > { %198 = vmatmul.bf16.vlgmr.msra.gmra.mxu0 %v29_v6 }
  0x26   : > { %211 = vmatmul.bf16.vlgmr.msra.gmra.mxu1 %v29_v6  ;;  %223 = vmatpush.bf16.msra.mxu2 %v305_v10 }
  0x29   : > { %224 = vmatmul.bf16.vlgmr.msra.gmra.mxu2 %v29_v6 }
  0xa2   : > { %v199_v13 = vpop.f32.mrf.mxu0 }
  0xa3   : > { %v229_v14 = vadd.f32 %v199_v13, %v26_v11  ;;  %v212_v15 = vpop.f32.mrf.mxu1 }
  0xa4   : > { %v249_v16 = vadd.f32 %v212_v15, %v27_v12 }
  0xa5   : > { %v390_v17 = vmul.f32 -1.442695, %v229_v14 }
  0xa6   : > { %v391_v18 = vmul.f32 -1.442695, %v249_v16 }
  0xa7   : > { %426 = vpow2.f32 %v390_v17 }
  0xa8   : > { %428 = vpow2.f32 %v391_v18 }
  0xaa   : > { %v201_v19 = vpop.f32.mrf.mxu0 }
  0xab   : > { %v214_v20 = vpop.f32.mrf.mxu1 }
  0xac   : > { %v225_v25 = vpop.f32.mrf.mxu2 }
  0xad   : > { %v427_v21 = vpop.eup %426 }
  0xae   : > { %v429_v22 = vpop.eup %428  ;;  %v233_v23 = vadd.f32 1.0, %v427_v21 }
  0xaf   : > { %v253_v24 = vadd.f32 1.0, %v429_v22 }
  0xb0   : > { %430 = vrcp.f32 %v233_v23  ;;  %vm239_vm4 = vweird.f32 %v233_v23  ;;  %v245_v43 = vand.u32 2147483648, %v233_v23  ;;  %v243_v45 = vand.u32 2147483647, %v233_v23 }
  0xb1   : > { %432 = vrcp.f32 %v253_v24  ;;  %v265_v33 = vand.u32 2147483648, %v253_v24  ;;  %v263_v35 = vand.u32 2147483647, %v253_v24  ;;  %vm259_vm1 = vweird.f32 %v253_v24 }
  0xb2   : > { %v246_v48 = vor.u32 1.1754944e-38, %v245_v43  ;;  %vm244_vm7 = vcmp.eq.f32.partialorder %v243_v45, 8.507059e+37 }
  0xb3   : > { %v266_v38 = vor.u32 1.1754944e-38, %v265_v33  ;;  %vm264_vm3 = vcmp.eq.f32.partialorder %v263_v35, 8.507059e+37 }
  0xb4   : > { %v227_v29 = vpop.f32.mrf.mxu2 }
  0xb6   : > { %v431_v26 = vpop.eup %430 }
  0xb7   : > { %v433_v27 = vpop.eup %432  ;;  %v235_v28 = vmul.f32 %v431_v26, %v233_v23  ;;  %vm240_vm5 = vweird.f32 %v431_v26 }
  0xb8   : > { %v255_v30 = vmul.f32 %v433_v27, %v253_v24  ;;  %vm260_vm0 = vweird.f32 %v433_v27  ;;  %vm241_vm6 = vmor %vm239_vm4, %vm240_vm5 }
  0xb9   : > { %v236_v31 = vsub.f32 1.0, %v235_v28  ;;  %vm261_vm2 = vmor %vm259_vm1, %vm260_vm0 }
  0xba   : > { %v256_v32 = vsub.f32 1.0, %v255_v30 }
  0xbb   : > { %v237_v36 = vmul.f32 %v431_v26, %v236_v31 }
  0xbc   : > { %v257_v34 = vmul.f32 %v433_v27, %v256_v32 }
  0xbd   : > { %v238_v41 = vadd.f32 %v431_v26, %v237_v36 }
  0xbe   : > { %v258_v37 = vadd.f32 %v433_v27, %v257_v34 }
  0xbf   : > { %v242_v47 = vsel %vm241_vm6, %v431_v26, %v238_v41 }
  0xc0   : > { %v262_v39 = vsel %vm261_vm2, %v433_v27, %v258_v37  ;;  %v247_v49 = vsel %vm244_vm7, %v246_v48, %v242_v47 }
  0xc1   : > { %v267_v42 = vsel %vm264_vm3, %v266_v38, %v262_v39  ;;  %v273_v50 = vsub.f32 1.0, %v247_v49  ;;  %v272_v52 = vmul.f32 %v247_v49, %v604_v2 }
  0xc2   : > { %v269_v44 = vmul.f32 %v267_v42, %v225_v25 }
  0xc4   : > { %v270_v46 = vadd.f32 %v269_v44, %v28_v40 }
  0xc6   : > { %434 = vtanh.f32 %v270_v46 }
  0xcc   : > { %v435_v51 = vpop.eup %434 }
  0xcd   : > { %v274_v53 = vmul.f32 %v435_v51, %v273_v50 }
  0xce   :  { %20 = sbr.rel (!%p18_p0) target bundleno = 3 (0x3), region = 41 }
  0xcf   : > { %v275_v54 = vadd.f32 %v274_v53, %v272_v52 }
  0xd1   : > { %276 = vst [vmem:[#allocation2] sm:$0xff] %v275_v54 }
  0xd2   : > { %279 = vst [vmem:[%s278_s9] sm:$0xff] %v275_v54 }

// kernel: encoder_decoder_forward.11
= control target key start
LH: loop header
LB: loop body
LE: loop exit
PB: predicated region body
PF: predicated region fallthrough
CT: control target
= control target key end

     0   :  { %s295_s1 = inlined_call_operand.vmem [shape: bf16[128,128], index: 1, kind: input, shape index: {}]   ;;  %s296_s2 = inlined_call_operand.vmem [shape: f32[1,128], index: 2, kind: input, shape index: {}]   ;;  %s297_s0 = inlined_call_operand.vmem [shape: f32[64,128], index: 0, kind: input, shape index: {}]   ;;  %s298_s3 = inlined_call_operand.vmem [shape: f32[64,128], index: 3, kind: output, shape index: {}]  }
   0x1   :  { %v174_v0 = vld [vmem:[%s295_s1 + $0x38] sm:$0xff]  ;;  %v173_v1 = vld [vmem:[%s295_s1 + $0x30] sm:$0xff]  ;;  %v172_v2 = vld [vmem:[%s295_s1 + $0x28] sm:$0xff] }
   0x2   :  { %94 = vmatpush.bf16.msra.mxu0 %v174_v0  ;;  %175 = vmatpush.bf16.msra.mxu1 %v174_v0  ;;  %v171_v3 = vld [vmem:[%s295_s1 + $0x20] sm:$0xff]  ;;  %v170_v4 = vld [vmem:[%s295_s1 + $0x18] sm:$0xff]  ;;  %v169_v5 = vld [vmem:[%s295_s1 + $0x10] sm:$0xff] }
   0x3   :  { %176 = vmatpush.bf16.msra.mxu2 %v174_v0  ;;  %177 = vmatpush.bf16.msra.mxu3 %v174_v0  ;;  %v168_v6 = vld [vmem:[%s295_s1 + $0x8] sm:$0xff]  ;;  %v167_v7 = vld [vmem:[%s295_s1] sm:$0xff]  ;;  %v16_v10 = vld [vmem:[%s297_s0 + $0x10] sm:$0xff] }
   0x4   :  { %v14_v8 = vld [vmem:[%s297_s0] sm:$0xff]  ;;  %v15_v9 = vld [vmem:[%s297_s0 + $0x8] sm:$0xff]  ;;  %v17_v11 = vld [vmem:[%s297_s0 + $0x18] sm:$0xff] }
   0x5   :  { %v18_v12 = vld [vmem:[%s297_s0 + $0x20] sm:$0xff]  ;;  %v19_v13 = vld [vmem:[%s297_s0 + $0x28] sm:$0xff]  ;;  %v20_v14 = vld [vmem:[%s297_s0 + $0x30] sm:$0xff]  ;;  %v22_v16 = vpack.c.bf16 %v15_v9, %v14_v8  ;;  %v23_v17 = vpack.c.bf16 %v17_v11, %v16_v10 }
   0x6   :  { %95 = vmatpush.bf16.msra.mxu0 %v173_v1  ;;  %178 = vmatpush.bf16.msra.mxu1 %v173_v1  ;;  %v21_v15 = vld [vmem:[%s297_s0 + $0x38] sm:$0xff]  ;;  %v24_v18 = vpack.c.bf16 %v19_v13, %v18_v12  ;;  %v199_v20 = vld [vmem:[%s296_s2] ss:$0 sm:$0xff] }
   0x7   :  { %179 = vmatpush.bf16.msra.mxu2 %v173_v1  ;;  %180 = vmatpush.bf16.msra.mxu3 %v173_v1  ;;  %v25_v19 = vpack.c.bf16 %v21_v15, %v20_v14 }
   0xa   :  { %96 = vmatpush.bf16.msra.mxu0 %v172_v2  ;;  %181 = vmatpush.bf16.msra.mxu1 %v172_v2 }
   0xb   :  { %182 = vmatpush.bf16.msra.mxu2 %v172_v2  ;;  %183 = vmatpush.bf16.msra.mxu3 %v172_v2 }
   0xe   :  { %97 = vmatpush.bf16.msra.mxu0 %v171_v3  ;;  %184 = vmatpush.bf16.msra.mxu1 %v171_v3 }
   0xf   :  { %185 = vmatpush.bf16.msra.mxu2 %v171_v3  ;;  %186 = vmatpush.bf16.msra.mxu3 %v171_v3 }
  0x12   :  { %98 = vmatpush.bf16.msra.mxu0 %v170_v4  ;;  %187 = vmatpush.bf16.msra.mxu1 %v170_v4 }
  0x13   :  { %188 = vmatpush.bf16.msra.mxu2 %v170_v4  ;;  %189 = vmatpush.bf16.msra.mxu3 %v170_v4 }
  0x16   :  { %99 = vmatpush.bf16.msra.mxu0 %v169_v5  ;;  %190 = vmatpush.bf16.msra.mxu1 %v169_v5 }
  0x17   :  { %191 = vmatpush.bf16.msra.mxu2 %v169_v5  ;;  %192 = vmatpush.bf16.msra.mxu3 %v169_v5 }
  0x1a   :  { %100 = vmatpush.bf16.msra.mxu0 %v168_v6  ;;  %193 = vmatpush.bf16.msra.mxu1 %v168_v6 }
  0x1b   :  { %194 = vmatpush.bf16.msra.mxu2 %v168_v6  ;;  %195 = vmatpush.bf16.msra.mxu3 %v168_v6 }
  0x1e   :  { %101 = vmatpush.bf16.msra.mxu0 %v167_v7  ;;  %196 = vmatpush.bf16.msra.mxu1 %v167_v7 }
  0x1f   :  { %197 = vmatpush.bf16.msra.mxu2 %v167_v7  ;;  %198 = vmatpush.bf16.msra.mxu3 %v167_v7 }
  0x21   :  { %102 = vmatmul.bf16.vlgmr.msra.gmra.mxu0 %v22_v16  ;;  %107 = vmatmul.bf16.vlgmr.msra.gmra.mxu1 %v23_v17 }
  0x22   :  { %112 = vmatmul.bf16.vlgmr.msra.gmra.mxu2 %v24_v18  ;;  %117 = vmatmul.bf16.vlgmr.msra.gmra.mxu3 %v25_v19 }
  0x9e   :  { %v103_v21 = vpop.f32.mrf.mxu0  ;;  %v108_v22 = vpop.f32.mrf.mxu1 }
  0x9f   :  { %v104_v23 = vadd.f32 %v199_v20, %v103_v21  ;;  %v109_v24 = vadd.f32 %v199_v20, %v108_v22 }
  0xa1   :  { %123 = vst [vmem:[%s298_s3] sm:$0xff] %v104_v23 }
  0xa2   :  { %125 = vst [vmem:[%s298_s3 + $0x10] sm:$0xff] %v109_v24 }
  0xa5   :  { %v113_v25 = vpop.f32.mrf.mxu2  ;;  %v118_v26 = vpop.f32.mrf.mxu3 }
  0xa6   :  { %v114_v27 = vadd.f32 %v199_v20, %v113_v25  ;;  %v119_v28 = vadd.f32 %v199_v20, %v118_v26  ;;  %v105_v29 = vpop.f32.mrf.mxu0  ;;  %v110_v30 = vpop.f32.mrf.mxu1 }
  0xa7   :  { %v106_v31 = vadd.f32 %v199_v20, %v105_v29  ;;  %v111_v32 = vadd.f32 %v199_v20, %v110_v30 }
  0xa8   :  { %127 = vst [vmem:[%s298_s3 + $0x20] sm:$0xff] %v114_v27 }
  0xa9   :  { %129 = vst [vmem:[%s298_s3 + $0x30] sm:$0xff] %v119_v28 }
  0xaa   :  { %124 = vst [vmem:[%s298_s3 + $0x8] sm:$0xff] %v106_v31 }
  0xab   :  { %126 = vst [vmem:[%s298_s3 + $0x18] sm:$0xff] %v111_v32 }
  0xad   :  { %v115_v33 = vpop.f32.mrf.mxu2  ;;  %v120_v34 = vpop.f32.mrf.mxu3 }
  0xae   :  { %v116_v35 = vadd.f32 %v199_v20, %v115_v33  ;;  %v121_v36 = vadd.f32 %v199_v20, %v120_v34 }
  0xb0   :  { %128 = vst [vmem:[%s298_s3 + $0x28] sm:$0xff] %v116_v35 }
  0xb1   :  { %130 = vst [vmem:[%s298_s3 + $0x38] sm:$0xff] %v121_v36 }

</bundles_post_ra>
